<compile_context>
chip_gen: v6e
topology: v6e:2x2x1
jax: 0.10.0
libtpu: 0.0.40
codegen_flags: <defaults>
</compile_context>

<pallas_src>
import jax
import jax.numpy as jnp
import numpy as np
from jax.experimental import pallas as pl
from jax.experimental.pallas import tpu as pltpu


def _decoder_kernel(adj_ref, z_ref, wa_ref, w1t_ref, b1_ref, w2t_ref, b2_ref,
                    matz_ref, out_ref):
    # adj_ref : (d, d)      f32   inverse(I - A^T), kept f32 for accuracy
    # z_ref   : (tb, d, Z)  bf16  batch tile in natural layout
    # wa_ref  : (1, Z)      f32
    # w1t_ref : (Z, H)      bf16   b1_ref: (1, H) f32
    # w2t_ref : (H, O)      bf16   b2_ref: (1, O) f32
    # matz_ref: (tb, d, Z)  bf16   out_ref: (tb, d, O) f32
    tb, d, Z = z_ref.shape

    wa = wa_ref[...]                                        # (1, Z) f32
    zw = z_ref[...].astype(jnp.float32) + wa                # (tb, d, Z) f32 (VPU)

    # mat_z[b] = adj @ (z[b] + Wa) - Wa  — canonical batched matmul with the
    # tiny adjacency broadcast along the batch-tile dim (no HBM/DMA blow-up,
    # no wasted MXU MACs, no in-kernel relayout).  f32 in / f32 acc.
    adj_b = jnp.broadcast_to(adj_ref[...], (tb, d, d))
    mat_z = jnp.einsum('bij,bjk->bik', adj_b, zw,
                       preferred_element_type=jnp.float32) - wa
    matz_ref[...] = mat_z.astype(matz_ref.dtype)            # bf16 writeback

    # H3 = relu(mat_z @ W1^T + b1): bf16 MXU operands, f32 accumulation.
    # Weights broadcast along the tile dim so this stays a batched matmul
    # (same pattern Mosaic handles in flash attention); K=N=32 under-fills the
    # MXU on every generation but is inherent to the model (see review item 8).
    w1t_b = jnp.broadcast_to(w1t_ref[...], (tb,) + tuple(w1t_ref.shape))
    h3 = jnp.maximum(
        jnp.einsum('bik,bkh->bih', mat_z.astype(jnp.bfloat16), w1t_b,
                   preferred_element_type=jnp.float32) + b1_ref[...],
        0.0)

    # out = H3 @ W2^T + b2
    w2t_b = jnp.broadcast_to(w2t_ref[...], (tb,) + tuple(w2t_ref.shape))
    out_ref[...] = (
        jnp.einsum('bik,bkh->bih', h3.astype(jnp.bfloat16), w2t_b,
                   preferred_element_type=jnp.float32) + b2_ref[...])


def _choose_batch_tile(B, d, target_rows=512):
    """Pick tb | B such that:
       * there are >= 2 grid steps when B >= 2 (v7x: both TensorCores used),
       * tb*d targets ~512 rows/step for large B (amortize ~0.35us/step),
    (block last-two-dims always equal the full (d, Z) extents, so any divisor
    of B is layout-legal)."""
    if B <= 1:
        return max(B, 1)
    tb_cap = max(1, B // 2)                        # keep >= 2 grid steps
    tb_target = min(tb_cap, max(1, target_rows // d))
    tb = 1
    for cand in range(1, tb_target + 1):           # largest divisor of B <= target
        if B % cand == 0:
            tb = cand
    return tb


def mlp_decoder_forward(input_z, origin_A, adj_A_tilt, Wa, W1, b1, W2, b2, *, tb=None):
    """Pallas implementation of MLPDecoder.forward.

    Returns (l1_loss, mat_z, out, adj_A_tilt), matching the PyTorch module.
    mat_z is returned in bfloat16 (see header notes); out is float32.
    """
    B, d, Z = input_z.shape
    H = W1.shape[0]
    O = W2.shape[0]
    f32, bf16 = jnp.float32, jnp.bfloat16

    if tb is None:
        tb = _choose_batch_tile(B, d)
    assert B % tb == 0

    # ---- glue that has no Pallas equivalent / is cheaper fused by XLA ----
    # preprocess_adj_new1: inverse(I - A^T).
    # TODO(synk): PyTorch computes this inverse in float64; TPU path uses float32
    # (matrix inverse also has no Pallas primitive, so it stays in plain JAX).
    adj_new1 = jnp.linalg.inv(jnp.eye(d, dtype=f32) - origin_A.T.astype(f32))

    # l1_loss = sum(|W1| + |W2|): tiny O(H*Z) reduction, wrapper-side.
    # Mirrors the PyTorch broadcast quirk — only defined for equal shapes.
    assert W1.shape == W2.shape, \
        "l1_loss = sum(|W1| + |W2|) requires W1.shape == W2.shape"
    l1_loss = jnp.sum(jnp.abs(W1.astype(f32)) + jnp.abs(W2.astype(f32)))

    z_bf16 = input_z.astype(bf16)            # halve the dominant streaming input
    wa2 = Wa.reshape(1, Z).astype(f32)
    w1t = W1.T.astype(bf16)                  # (Z, H): no in-kernel transpose
    w2t = W2.T.astype(bf16)                  # (H, O)
    b1_2 = b1.reshape(1, H).astype(f32)
    b2_2 = b2.reshape(1, O).astype(f32)

    out_shapes = (
        jax.ShapeDtypeStruct((B, d, Z), bf16),   # mat_z
        jax.ShapeDtypeStruct((B, d, O), f32),    # out
    )

    # VMEM footprint per step is tens of KiB at these model dims — far under
    # every generation's scoped limit; no vmem_limit_bytes needed.
    grid_spec = pltpu.PrefetchScalarGridSpec(
        num_scalar_prefetch=0,
        grid=(B // tb,),
        in_specs=[
            pl.BlockSpec((d, d), lambda i: (0, 0)),        # adj (resident, f32)
            pl.BlockSpec((tb, d, Z), lambda i: (i, 0, 0)),  # z tile (streams)
            pl.BlockSpec((1, Z), lambda i: (0, 0)),        # Wa
            pl.BlockSpec((Z, H), lambda i: (0, 0)),        # W1^T
            pl.BlockSpec((1, H), lambda i: (0, 0)),        # b1
            pl.BlockSpec((H, O), lambda i: (0, 0)),        # W2^T
            pl.BlockSpec((1, O), lambda i: (0, 0)),        # b2
        ],
        out_specs=[
            pl.BlockSpec((tb, d, Z), lambda i: (i, 0, 0)),  # mat_z tile
            pl.BlockSpec((tb, d, O), lambda i: (i, 0, 0)),  # out tile
        ],
    )

    mat_z, out = pl.pallas_call(
        _decoder_kernel,
        out_shape=out_shapes,
        grid_spec=grid_spec,
        compiler_params=pltpu.CompilerParams(
            dimension_semantics=("parallel",)),             # batch tiles independent
    )(adj_new1, z_bf16, wa2, w1t, b1_2, w2t, b2_2)

    return l1_loss, mat_z, out, adj_A_tilt


def _reference_forward(input_z, origin_A, adj_A_tilt, Wa, W1, b1, W2, b2):
    d = origin_A.shape[0]
    adj_new1 = jnp.linalg.inv(jnp.eye(d, dtype=jnp.float32) - origin_A.T)
    mat_z = jnp.einsum("ij,bjk->bik", adj_new1, input_z + Wa) - Wa
    h3 = jax.nn.relu(mat_z @ W1.T + b1)
    out = h3 @ W2.T + b2
    l1 = jnp.sum(jnp.abs(W1) + jnp.abs(W2))
    return l1, mat_z, out, adj_A_tilt


def _xavier_normal(key, shape):
    fan_out, fan_in = shape
    std = np.sqrt(2.0 / (fan_in + fan_out))
    return std * jax.random.normal(key, shape, dtype=jnp.float32)


def _run_case(B, d, Z, H, O, seed=0):
    key = jax.random.PRNGKey(seed)
    k_z, k_A, k_tilt, k_wa, k_w1, k_w2 = jax.random.split(key, 6)

    input_z = jax.random.normal(k_z, (B, d, Z), dtype=jnp.float32)
    # Keep origin_A small so (I - A^T) is well-conditioned.
    origin_A = 0.1 * jax.random.normal(k_A, (d, d), dtype=jnp.float32)
    adj_A_tilt = jax.random.normal(k_tilt, (d, d), dtype=jnp.float32)
    Wa = 0.1 * jax.random.normal(k_wa, (Z,), dtype=jnp.float32)

    # Deterministic parameter init (xavier_normal weights, zero biases).
    W1 = _xavier_normal(k_w1, (H, Z))
    b1 = jnp.zeros((H,), dtype=jnp.float32)
    W2 = _xavier_normal(k_w2, (O, H))
    b2 = jnp.zeros((O,), dtype=jnp.float32)

    l1, mat_z, out, tilt = mlp_decoder_forward(
        input_z, origin_A, adj_A_tilt, Wa, W1, b1, W2, b2)
    jax.block_until_ready((l1, mat_z, out, tilt))

    # Numerical check against the plain-JAX f32 reference.  Tolerances are
    # loosened because the kernel streams z / stores mat_z in bf16 and uses
    # bf16 MXU operands for the MLP (f32 accumulation).
    l1_r, mat_z_r, out_r, _ = _reference_forward(
        input_z, origin_A, adj_A_tilt, Wa, W1, b1, W2, b2)
    assert np.allclose(np.asarray(l1), np.asarray(l1_r), rtol=1e-5, atol=1e-5)
    assert np.allclose(np.asarray(mat_z, dtype=np.float32),
                       np.asarray(mat_z_r), rtol=5e-2, atol=5e-2)
    assert np.allclose(np.asarray(out, dtype=np.float32),
                       np.asarray(out_r), rtol=5e-2, atol=5e-2)


if __name__ == "__main__":
    # Small shapes consistent with the module. n_in_z == n_hid == n_out so the
    # PyTorch broadcast |W1| + |W2| in the L1 loss is well-defined.
    _run_case(B=2, d=8, Z=32, H=32, O=32, seed=0)   # tb=1, grid=(2,)  (v7x: 2 TCs)
    _run_case(B=8, d=8, Z=32, H=32, O=32, seed=1)   # tb=4, grid=(2,)  (batched path)
    print("KERNEL_OK")
</pallas_src>

<mosaic_0001>
module attributes {stable_mosaic.version = 11 : i64} {
  func.func @_decoder_kernel(%arg0: i32, %arg1: memref<8x8xf32, #tpu.memory_space<vmem>>, %arg2: memref<1x8x32xbf16, #tpu.memory_space<vmem>>, %arg3: memref<1x32xf32, #tpu.memory_space<vmem>>, %arg4: memref<32x32xbf16, #tpu.memory_space<vmem>>, %arg5: memref<1x32xf32, #tpu.memory_space<vmem>>, %arg6: memref<32x32xbf16, #tpu.memory_space<vmem>>, %arg7: memref<1x32xf32, #tpu.memory_space<vmem>>, %arg8: memref<1x8x32xbf16, #tpu.memory_space<vmem>>, %arg9: memref<1x8x32xf32, #tpu.memory_space<vmem>>) attributes {dimension_semantics = [#tpu.dimension_semantics<parallel>], iteration_bounds = array<i64: 2>, scalar_prefetch = 0 : i64, scratch_operands = 0 : i64, tpu.core_type = #tpu.core_type<tc>, window_params = [{pipeline_mode = #tpu.pipeline_mode<synchronous>, transform_indices = @transform_0, window_bounds = array<i64: 8, 8>}, {transform_indices = @transform_1, window_bounds = array<i64: 1, 8, 32>}, {pipeline_mode = #tpu.pipeline_mode<synchronous>, transform_indices = @transform_2, window_bounds = array<i64: 1, 32>}, {pipeline_mode = #tpu.pipeline_mode<synchronous>, transform_indices = @transform_3, window_bounds = array<i64: 32, 32>}, {pipeline_mode = #tpu.pipeline_mode<synchronous>, transform_indices = @transform_4, window_bounds = array<i64: 1, 32>}, {pipeline_mode = #tpu.pipeline_mode<synchronous>, transform_indices = @transform_5, window_bounds = array<i64: 32, 32>}, {pipeline_mode = #tpu.pipeline_mode<synchronous>, transform_indices = @transform_6, window_bounds = array<i64: 1, 32>}, {transform_indices = @transform_7, window_bounds = array<i64: 1, 8, 32>}, {transform_indices = @transform_8, window_bounds = array<i64: 1, 8, 32>}]} {
    %c0 = arith.constant 0 : index
    %c0_0 = arith.constant 0 : index
    %0 = vector.load %arg3[%c0, %c0_0] : memref<1x32xf32, #tpu.memory_space<vmem>>, vector<1x32xf32>
    %c0_1 = arith.constant 0 : index
    %c0_2 = arith.constant 0 : index
    %c0_3 = arith.constant 0 : index
    %1 = vector.load %arg2[%c0_1, %c0_2, %c0_3] : memref<1x8x32xbf16, #tpu.memory_space<vmem>>, vector<1x8x32xbf16>
    %2 = arith.extf %1 : vector<1x8x32xbf16> to vector<1x8x32xf32>
    %3 = vector.shape_cast %0 : vector<1x32xf32> to vector<1x1x32xf32>
    %4 = vector.broadcast %3 : vector<1x1x32xf32> to vector<1x8x32xf32>
    %5 = arith.addf %2, %4 : vector<1x8x32xf32>
    %c0_4 = arith.constant 0 : index
    %c0_5 = arith.constant 0 : index
    %6 = vector.load %arg1[%c0_4, %c0_5] : memref<8x8xf32, #tpu.memory_space<vmem>>, vector<8x8xf32>
    %7 = vector.shape_cast %6 : vector<8x8xf32> to vector<1x8x8xf32>
    "tpu.trace_start"() <{level = 10 : i32, message = "bij,bjk->bik"}> : () -> ()
    %cst = arith.constant dense<0.000000e+00> : vector<1x8x32xf32>
    %8 = tpu.matmul %7, %5, %cst {dimension_numbers = #tpu.dot_dimension_numbers<[2], [1], [1], [2], [0, 0, 0, 1, 1, 2], [0], [0]>} : vector<1x8x8xf32>, vector<1x8x32xf32>, vector<1x8x32xf32> -> vector<1x8x32xf32>
    "tpu.trace_stop"() : () -> ()
    %9 = vector.shape_cast %0 : vector<1x32xf32> to vector<1x1x32xf32>
    %10 = vector.broadcast %9 : vector<1x1x32xf32> to vector<1x8x32xf32>
    %11 = arith.subf %8, %10 : vector<1x8x32xf32>
    %12 = arith.truncf %11 : vector<1x8x32xf32> to vector<1x8x32xbf16>
    %c0_6 = arith.constant 0 : index
    %c0_7 = arith.constant 0 : index
    %c0_8 = arith.constant 0 : index
    %13 = vector.load %arg8[%c0_6, %c0_7, %c0_8] : memref<1x8x32xbf16, #tpu.memory_space<vmem>>, vector<1x8x32xbf16>
    tpu.vector_store %arg8[%c0_6, %c0_7, %c0_8], %12 {strides = array<i32>} : memref<1x8x32xbf16, #tpu.memory_space<vmem>>, vector<1x8x32xbf16>,
    %c0_9 = arith.constant 0 : index
    %c0_10 = arith.constant 0 : index
    %14 = vector.load %arg4[%c0_9, %c0_10] : memref<32x32xbf16, #tpu.memory_space<vmem>>, vector<32x32xbf16>
    %15 = vector.shape_cast %14 : vector<32x32xbf16> to vector<1x32x32xbf16>
    %16 = arith.truncf %11 : vector<1x8x32xf32> to vector<1x8x32xbf16>
    "tpu.trace_start"() <{level = 10 : i32, message = "bik,bkh->bih"}> : () -> ()
    %cst_11 = arith.constant dense<0.000000e+00> : vector<1x8x32xf32>
    %17 = tpu.matmul %16, %15, %cst_11 {dimension_numbers = #tpu.dot_dimension_numbers<[2], [1], [1], [2], [0, 0, 0, 1, 1, 2], [0], [0]>} : vector<1x8x32xbf16>, vector<1x32x32xbf16>, vector<1x8x32xf32> -> vector<1x8x32xf32>
    "tpu.trace_stop"() : () -> ()
    %c0_12 = arith.constant 0 : index
    %c0_13 = arith.constant 0 : index
    %18 = vector.load %arg5[%c0_12, %c0_13] : memref<1x32xf32, #tpu.memory_space<vmem>>, vector<1x32xf32>
    %19 = vector.shape_cast %18 : vector<1x32xf32> to vector<1x1x32xf32>
    %20 = vector.broadcast %19 : vector<1x1x32xf32> to vector<1x8x32xf32>
    %21 = arith.addf %17, %20 : vector<1x8x32xf32>
    %cst_14 = arith.constant 0.000000e+00 : f32
    %22 = vector.broadcast %cst_14 : f32 to vector<1x8x32xf32>
    %23 = arith.maximumf %21, %22 : vector<1x8x32xf32>
    %c0_15 = arith.constant 0 : index
    %c0_16 = arith.constant 0 : index
    %24 = vector.load %arg6[%c0_15, %c0_16] : memref<32x32xbf16, #tpu.memory_space<vmem>>, vector<32x32xbf16>
    %25 = vector.shape_cast %24 : vector<32x32xbf16> to vector<1x32x32xbf16>
    %26 = arith.truncf %23 : vector<1x8x32xf32> to vector<1x8x32xbf16>
    "tpu.trace_start"() <{level = 10 : i32, message = "bik,bkh->bih"}> : () -> ()
    %cst_17 = arith.constant dense<0.000000e+00> : vector<1x8x32xf32>
    %27 = tpu.matmul %26, %25, %cst_17 {dimension_numbers = #tpu.dot_dimension_numbers<[2], [1], [1], [2], [0, 0, 0, 1, 1, 2], [0], [0]>} : vector<1x8x32xbf16>, vector<1x32x32xbf16>, vector<1x8x32xf32> -> vector<1x8x32xf32>
    "tpu.trace_stop"() : () -> ()
    %c0_18 = arith.constant 0 : index
    %c0_19 = arith.constant 0 : index
    %28 = vector.load %arg7[%c0_18, %c0_19] : memref<1x32xf32, #tpu.memory_space<vmem>>, vector<1x32xf32>
    %29 = vector.shape_cast %28 : vector<1x32xf32> to vector<1x1x32xf32>
    %30 = vector.broadcast %29 : vector<1x1x32xf32> to vector<1x8x32xf32>
    %31 = arith.addf %27, %30 : vector<1x8x32xf32>
    %c0_20 = arith.constant 0 : index
    %c0_21 = arith.constant 0 : index
    %c0_22 = arith.constant 0 : index
    %32 = vector.load %arg9[%c0_20, %c0_21, %c0_22] : memref<1x8x32xf32, #tpu.memory_space<vmem>>, vector<1x8x32xf32>
    tpu.vector_store %arg9[%c0_20, %c0_21, %c0_22], %31 {strides = array<i32>} : memref<1x8x32xf32, #tpu.memory_space<vmem>>, vector<1x8x32xf32>,
    return
  }
  func.func @transform_0(%arg0: i32) -> (i32, i32) {
    %c0_i32 = arith.constant 0 : i32
    %c0_i32_0 = arith.constant 0 : i32
    %c0_i32_1 = arith.constant 0 : i32
    return %c0_i32, %c0_i32_0 : i32, i32
  }
  func.func @transform_1(%arg0: i32) -> (i32, i32, i32) {
    %c0_i32 = arith.constant 0 : i32
    %c0_i32_0 = arith.constant 0 : i32
    %c0_i32_1 = arith.constant 0 : i32
    return %arg0, %c0_i32, %c0_i32_0 : i32, i32, i32
  }
  func.func @transform_2(%arg0: i32) -> (i32, i32) {
    %c0_i32 = arith.constant 0 : i32
    %c0_i32_0 = arith.constant 0 : i32
    %c0_i32_1 = arith.constant 0 : i32
    return %c0_i32, %c0_i32_0 : i32, i32
  }
  func.func @transform_3(%arg0: i32) -> (i32, i32) {
    %c0_i32 = arith.constant 0 : i32
    %c0_i32_0 = arith.constant 0 : i32
    %c0_i32_1 = arith.constant 0 : i32
    return %c0_i32, %c0_i32_0 : i32, i32
  }
  func.func @transform_4(%arg0: i32) -> (i32, i32) {
    %c0_i32 = arith.constant 0 : i32
    %c0_i32_0 = arith.constant 0 : i32
    %c0_i32_1 = arith.constant 0 : i32
    return %c0_i32, %c0_i32_0 : i32, i32
  }
  func.func @transform_5(%arg0: i32) -> (i32, i32) {
    %c0_i32 = arith.constant 0 : i32
    %c0_i32_0 = arith.constant 0 : i32
    %c0_i32_1 = arith.constant 0 : i32
    return %c0_i32, %c0_i32_0 : i32, i32
  }
  func.func @transform_6(%arg0: i32) -> (i32, i32) {
    %c0_i32 = arith.constant 0 : i32
    %c0_i32_0 = arith.constant 0 : i32
    %c0_i32_1 = arith.constant 0 : i32
    return %c0_i32, %c0_i32_0 : i32, i32
  }
  func.func @transform_7(%arg0: i32) -> (i32, i32, i32) {
    %c0_i32 = arith.constant 0 : i32
    %c0_i32_0 = arith.constant 0 : i32
    %c0_i32_1 = arith.constant 0 : i32
    return %arg0, %c0_i32, %c0_i32_0 : i32, i32, i32
  }
  func.func @transform_8(%arg0: i32) -> (i32, i32, i32) {
    %c0_i32 = arith.constant 0 : i32
    %c0_i32_0 = arith.constant 0 : i32
    %c0_i32_1 = arith.constant 0 : i32
    return %arg0, %c0_i32, %c0_i32_0 : i32, i32, i32
  }
}

</mosaic_0001>

<bundles_post_ra>
// kernel: tpu_custom_call.1
= control target key start
LH: loop header
LB: loop body
LE: loop exit
PB: predicated region body
PF: predicated region fallthrough
CT: control target
= control target key end

     0   :  { %s1415_s0 = inlined_call_operand.hbm [shape: f32[8,8], index: 0, kind: input, shape index: {}]   ;;  %s1416_s1 = inlined_call_operand.hbm [shape: bf16[2,8,32], index: 1, kind: input, shape index: {}]   ;;  %s1417_s2 = inlined_call_operand.vmem [shape: f32[1,32], index: 2, kind: input, shape index: {}]   ;;  %s1418_s3 = inlined_call_operand.hbm [shape: bf16[32,32], index: 3, kind: input, shape index: {}]   ;;  %s1419_s4 = inlined_call_operand.vmem [shape: f32[1,32], index: 4, kind: input, shape index: {}]   ;;  %s1420_s5 = inlined_call_operand.hbm [shape: bf16[32,32], index: 5, kind: input, shape index: {}]   ;;  %s1421_s6 = inlined_call_operand.vmem [shape: f32[1,32], index: 6, kind: input, shape index: {}]   ;;  %s1422_s7 = inlined_call_operand.hbm [shape: bf16[2,8,32], index: 7, kind: output, shape index: {0}]   ;;  %s1423_s8 = inlined_call_operand.hbm [shape: f32[2,8,32], index: 8, kind: output, shape index: {1}]  }
   0x1   :  { %1428 = sst [smem:[#allocation19_spill]] %s1415_s0 }
   0x2   :  { %1429 = sst [smem:[#allocation20_spill]] %s1418_s3 }
   0x3   :  { %1430 = sst [smem:[#allocation21_spill]] %s1420_s5 }
   0x4   :  { %14 = vsyncpa [#allocation3], 0 }
   0x5   :  { %15 = vsyncpa [#allocation6], 0 }
   0x6   :  { %17 = vsyncpa [#allocation6 + $0x1], 0 }
   0x7   :  { %18 = vsyncpa [#allocation9], 0 }
   0x8   :  { %19 = vsyncpa [#allocation4], 0 }
   0x9   :  { %21 = vsyncpa [#allocation4 + $0x1], 0 }
   0xa   :  { %22 = vsyncpa [#allocation12], 0 }
   0xb   :  { %24 = vsyncpa [#allocation12 + $0x1], 0  ;;  %s1184_s27 = smov 0   ;;  %s1186_s28 = smov 0  }
   0xc   :  { %s1188_s29 = smov 0   ;;  %s1190_s30 = smov 0  }
   0xd LB: > { %s1205_s9 = sadd.s32 4294967295, %s1127_s30   ;;  %s765_s10 = sadd.s32 4294967294, %s1127_s30   ;;  %s1127_s30 = sphi %s1190_s30, %s1455_s30   ;;  %s1123_s29 = sphi %s1188_s29, %s1454_s29   ;;  %s1119_s28 = sphi %s1186_s28, %s1453_s28   ;;  %s1115_s27 = sphi %s1184_s27, %s1452_s27  }
   0xe   : > { %p71_p0 = scmp.ne.s32.totalorder %s1119_s28, %s1115_s27  ;;  %p1424_p1 = scmp.eq.s32.totalorder %s1205_s9, 0 }
   0xf   : > { %p206_p3 = scmp.eq.s32.totalorder %s765_s10, 1  ;;  %p766_p5 = scmp.ge.s32.totalorder %s1127_s30, 1 }
  0x10   : > { %p1214_p4 = por %p1424_p1, %p71_p0  ;;  %p239_p7 = scmp.lt.s32.totalorder %s1127_s30, 3 }
  0x11   : > { %p1219_p6 = por %p206_p3, %p71_p0  ;;  %s1129_s14 = smov [#allocation7]  }
  0x12   : > { %s1431_s11 = scalar_select %p1214_p4, 1, 0 }
  0x13   : > { %s1432_s12 = scalar_select %p1219_p6, 1, 0 }
  0x14   : > { %p1224_p8 = pnand %p766_p5, %p239_p7  ;;  %s265_s15 = sshll.u32 %s1129_s14, 4  ;;  %s266_s15 = int_to_ptr.vmem [resolvable:$true] %s265_s15 }
  0x15   : > { %s1130_s17 = smov [#allocation2]   ;;  %s1131_s19 = smov [#allocation8]  }
  0x16   : > { %s1433_s13 = scalar_select %p1224_p8, 1, 0 }
  0x17   : > { %p843_p9 = pneg %p1224_p8  ;;  %s252_s18 = sshll.u32 %s1130_s17, 4  ;;  %s253_s18 = int_to_ptr.vmem [resolvable:$true] %s252_s18 }
  0x18   : > { %s281_s20 = sshll.u32 %s1131_s19, 4  ;;  %s926_s21 = scalar_lea.vmem %s266_s15, 256  ;;  %s282_s20 = int_to_ptr.vmem [resolvable:$true] %s281_s20 }
  0x19   : > { %p1233_p11 = pnand %p843_p9, %p1424_p1  ;;  %p927_p13 = scmp.ne.s32.totalorder %s266_s15, %s926_s21 }
  0x1a   : > { %p934_p5 = scmp.lt.s32.totalorder %s266_s15, %s266_s15  ;;  %p935_p7 = scmp.lt.s32.totalorder %s926_s21, %s926_s21 }
  0x1b   : > { %p917_p12 = pneg %p1233_p11 }
  0x1c   : > { %p936_p9 = por %p935_p7, %p934_p5 }
  0x1d   : > { %p929_p0 = pnand %p927_p13, %p917_p12 }
  0x1f   : > { %p930_p3 = pneg %p929_p0 }
  0x21   : > { %p937_p10 = pnand %p936_p9, %p930_p3 }
  0x23   : > { %940 = shalt.err (!%p937_p10)
}
  0x24   : > { %s1132_s22 = smov 64   ;;  %s1133_s23 = smov 4  }
  0x25   : > { %s1435_s3 = sld [smem:[#allocation20_spill]]  ;;  %s952_s26 = scalar_lea.vmem %s253_s18, 128 }
  0x26   : > { %p953_p1 = scmp.ne.s32.totalorder %s253_s18, %s952_s26  ;;  %p960_p2 = scmp.lt.s32.totalorder %s253_s18, %s253_s18 }
  0x27   : > { %p961_p6 = scmp.lt.s32.totalorder %s952_s26, %s952_s26 }
  0x28   : > { %p955_p13 = pnand %p953_p1, %p917_p12 }
  0x29   : > { %p962_p5 = por %p961_p6, %p960_p2 }
  0x2a   : > { %p956_p0 = pneg %p955_p13 }
  0x2b   : > { %849 = dma.hbm_to_vmem [thread:$0]  (!%p1233_p11), %s1435_s3, 256, %s266_s15, [#allocation6], %s1132_s22, %s1132_s22, %s1133_s23  }
  0x2c   : > { %p963_p3 = pnand %p962_p5, %p956_p0 }
  0x2e   : > { %966 = shalt.err (!%p963_p3)
}
  0x2f   : > { %s1436_s0 = sld [smem:[#allocation19_spill]]  ;;  %s978_s15 = scalar_lea.vmem %s282_s20, 256 }
  0x30   : > { %p979_p10 = scmp.ne.s32.totalorder %s282_s20, %s978_s15  ;;  %p986_p9 = scmp.lt.s32.totalorder %s282_s20, %s282_s20 }
  0x31   : > { %p987_p13 = scmp.lt.s32.totalorder %s978_s15, %s978_s15 }
  0x32   : > { %p981_p7 = pnand %p979_p10, %p917_p12 }
  0x33   : > { %p988_p4 = por %p987_p13, %p986_p9 }
  0x34   : > { %p982_p1 = pneg %p981_p7 }
  0x35   : > { %846 = dma.hbm_to_vmem [thread:$0]  (!%p1233_p11), %s1436_s0, 128, %s253_s18, [#allocation3]  }
  0x36   : > { %p989_p2 = pnand %p988_p4, %p982_p1 }
  0x38   : > { %992 = shalt.err (!%p989_p2)
}
  0x39   : > { %s1437_s5 = sld [smem:[#allocation21_spill]]  ;;  %s1264_s18 = sadd.s32 1, %s1127_s30  }
  0x3a   : > { %s55_s16 = ssub.s32 %s1127_s30, %s1264_s18  ;;  %s58_s21 = sadd.s32 1, %s1123_s29 }
  0x3b   : > { %p56_p4 = scmp.eq.s32.totalorder %s55_s16, 0  ;;  %p65_p6 = scmp.ne.s32.totalorder %s1123_s29, %s1119_s28 }
  0x3c   : > { %p66_p12 = scmp.eq.s32.totalorder %s1127_s30, 0  ;;  %p867_p0 = scmp.lt.s32.totalorder %s1127_s30, 2 }
  0x3d   : > { %s1274_s24 = scalar_select %p56_p4, %s1123_s29, %s58_s21  }
  0x3e   : > { %p67_p5 = por %p66_p12, %p65_p6  ;;  %p1438_p3 = scmp.eq.s32.totalorder %s1205_s9, 1 }
  0x3f   : > { %852 = dma.hbm_to_vmem [thread:$0]  (!%p1233_p11), %s1437_s5, 256, %s282_s20, [#allocation9], %s1132_s22, %s1132_s22, %s1133_s23  }
  0x40   : > { %p1278_p10 = por %p1438_p3, %p65_p6  ;;  %s298_s26 = sand.u32 1, %s1127_s30  }
  0x41   : > { %s300_s10 = sand.u32 1, %s1123_s29   ;;  %s772_s22 = sshll.u32 %s1127_s30, 6 }
  0x42   : > { %s1439_s25 = scalar_select %p1278_p10, 1, 0 }
  0x43   : > { %s771_s20 = sshll.u32 %s300_s10, 2  ;;  %s1288_s15 = scalar_lea.hbm %s1416_s1, %s772_s22 }
  0x44   : > { %s302_s17 = scalar_lea.vmem [#allocation5], %s771_s20  ;;  %p1290_p11 = pnand %p867_p0, %p67_p5 }
  0x45   : > { %s309_s19 = sshll.u32 %s302_s17, 4  ;;  %s299_s21 = scalar_lea.sflag [#allocation6], %s298_s26  ;;  %s310_s19 = int_to_ptr.vmem [resolvable:$true] %s309_s19 }
  0x46   : > { %s993_s0 = scalar_lea.hbm %s1288_s15, 64  ;;  %p995_p1 = pneg %p1290_p11 }
  0x47   : > { %p994_p7 = scmp.ne.s32.totalorder %s1288_s15, %s993_s0  ;;  %s998_s23 = scalar_lea.hbm %s1416_s1, 128 }
  0x48   : > { %p999_p2 = scmp.lt.s32.totalorder %s1288_s15, %s1416_s1  ;;  %p1000_p4 = scmp.lt.s32.totalorder %s998_s23, %s993_s0 }
  0x49   : > { %p996_p9 = pnand %p995_p1, %p994_p7 }
  0x4a   : > { %p1001_p6 = por %p1000_p4, %p999_p2 }
  0x4b   : > { %p997_p13 = pneg %p996_p9 }
  0x4d   : > { %p1002_p12 = pnand %p1001_p6, %p997_p13 }
  0x4f   : > { %1005 = shalt.err (!%p1002_p12)
}
  0x50   : > { %s1006_s17 = scalar_lea.vmem %s310_s19, 64  ;;  %s1134_s26 = smov [#allocation5]  }
  0x51   : > { %p1007_p0 = scmp.ne.s32.totalorder %s310_s19, %s1006_s17  ;;  %s1011_s3 = sshll.u32 %s1134_s26, 4  ;;  %s1012_s3 = int_to_ptr.vmem [resolvable:$false] %s1011_s3 }
  0x52   : > { %s1013_s5 = scalar_lea.vmem %s1012_s3, 128  ;;  %p1014_p7 = scmp.lt.s32.totalorder %s310_s19, %s1012_s3 }
  0x53   : > { %p1009_p5 = pnand %p1007_p0, %p995_p1  ;;  %p1015_p9 = scmp.lt.s32.totalorder %s1013_s5, %s1006_s17 }
  0x55   : > { %p1010_p3 = pneg %p1009_p5  ;;  %p1016_p10 = por %p1015_p9, %p1014_p7 }
  0x57   : > { %p1017_p8 = pnand %p1016_p10, %p1010_p3 }
  0x59   : > { %1020 = shalt.err (!%p1017_p8)
}
  0x5a   : > { %856 = dma.hbm_to_vmem [thread:$0]  (!%p1290_p11), %s1288_s15, 64, %s310_s19, %s299_s21  }
  0x5b   : > { %p1441_p13 = scmp.ne.s32.totalorder %s1433_s13, 0 }
  0x5c   : > { %p1442_p2 = scmp.eq.s32.totalorder (!%p1441_p13), %s1205_s9, 0 }
  0x5d   : > { %318 = sbr.rel (%p1441_p13) target bundleno = 722 (0x2d2), region = 48 }
  0x62   : > { %1090 = dma.done.wait (%p1442_p2), [#allocation3], 128   ;;  %p1443_p1 = pmov %p1442_p2 }
  0x63   : > { %s324_s0 = sand.u32 1, %s1205_s9   ;;  %s1316_s3 = sand.u32 1, %s1119_s28  }
  0x64   : > { %1092 = vsyncadd (%p1443_p1), [#allocation3], 4294967168  ;;  %s775_s5 = sshll.u32 %s1316_s3, 2  ;;  %s325_s16 = scalar_lea.sflag [#allocation6], %s324_s0 }
  0x65   : > { %s328_s15 = scalar_lea.vmem [#allocation5], %s775_s5  ;;  %p1444_p8 = scmp.ne.s32.totalorder %s1431_s11, 0 }
  0x67   : > { %1094 = dma.done.wait (%p1444_p8), %s325_s16, 64  }
  0x68   : > { %1096 = vsyncadd (%p1444_p8), %s325_s16, 4294967232  ;;  %p1445_p10 = pmov %p1443_p1 }
  0x69   : > { %p1446_p11 = pmov %p1443_p1 }
  0x6a   : > { %1098 = dma.done.wait (%p1445_p10), [#allocation6], 256  }
  0x6b   : > { %1100 = vsyncadd (%p1446_p11), [#allocation6], 4294967040  ;;  %p1447_p4 = pmov %p1443_p1 }
  0x6c   : > { %p1448_p6 = pmov %p1443_p1 }
  0x6d   : > { %1102 = dma.done.wait (%p1447_p4), [#allocation9], 256  }
  0x6e   : > { %1104 = vsyncadd (%p1448_p6), [#allocation9], 4294967040  ;;  %v1135_v0 = vmov 0.0   ;;  %vm1136_vm0 = vmmov 0   ;;  %v780_v1 = vld [vmem:[%s1417_s2] ss:$0 sm:$0xff] }
  0x6f   : > { %804 = vmatprep.subr.mxu0 %v1135_v0  ;;  %806 = vmatprep.mubr.msk.f32.mxu0 %vm1136_vm0, %v1135_v0  ;;  %v376_v2 = vld [vmem:[%s328_s15] sm:$0xf]  ;;  %v385_v4 = vld [vmem:[#allocation2] sm:$0xff]  ;;  %vm386_vm1 = vcmask 64512   ;;  %v911_v5 = vld [vmem:[#allocation7 + $0x8] sm:$0xff]   ;;  %vm487_vm2 = vcmask 261120  }
  0x70   : > { %809 = vmatprep.subr.bf16.mxu1 %v1135_v0  ;;  %813 = vmatprep.mubr.msk.bf16.mxu1 %vm1136_vm0, %v1135_v0  ;;  %v377_v3 = vunpack.c.l.bf16 %v376_v2  ;;  %v912_v7 = vld [vmem:[#allocation7] sm:$0xff]   ;;  %vm462_vm3 = vcmask 257024   ;;  %s366_s19 = scalar_lea.vmem [#allocation10], %s775_s5  ;;  %v913_v12 = vld [vmem:[#allocation8 + $0x8] sm:$0xff]   ;;  %v914_v13 = vld [vmem:[#allocation8] sm:$0xff]   ;;  %s792_s22 = sshll.u32 %s1205_s9, 6 }
  0x71   : > { %810 = vmatpush3.bf16.msra.mxu1 %v911_v5  ;;  %v782_v14 = vld [vmem:[%s1419_s4] ss:$0 sm:$0xff]  ;;  %s619_s23 = sshll.u32 %s366_s19, 4  ;;  %s617_s17 = scalar_lea.hbm %s1422_s7, %s792_s22  ;;  %s620_s23 = int_to_ptr.vmem [resolvable:$true] %s619_s23 }
  0x72   : > { %v384_v6 = vadd.f32 %v780_v1, %v377_v3  ;;  %811 = vmatprep.subr.bf16.mxu1 %v1135_v0  ;;  %s601_s26 = scalar_lea.sflag [#allocation4], %s1316_s3  ;;  %s1021_s0 = scalar_lea.vmem %s620_s23, 64 }
  0x73   : > { %p1022_p12 = scmp.ne.s32.totalorder %s620_s23, %s1021_s0  ;;  %p1449_p0 = scmp.ne.s32.totalorder %s1439_s25, 0 }
  0x74   : > { %805 = vmatpush3.msra.mxu0 %v384_v6  ;;  %s1137_s5 = smov [#allocation10]  }
  0x75   : > { %807 = vmatmul.mubr.msk.f32.vlgmr.msra.gmra.mxu0 %vm386_vm1, %v385_v4  ;;  %817 = vmatprep.subr.bf16.mxu0 %v1135_v0  ;;  %p1023_p5 = pnand %p1022_p12, %p1449_p0  ;;  %s1025_s16 = sshll.u32 %s1137_s5, 4  ;;  %s1026_s16 = int_to_ptr.vmem [resolvable:$false] %s1025_s16 }
  0x76   : > { %821 = vmatprep.mubr.msk.bf16.mxu0 %vm1136_vm0, %v1135_v0  ;;  %812 = vmatpush3.bf16.msra.mxu1 %v912_v7  ;;  %s1027_s15 = scalar_lea.vmem %s1026_s16, 128  ;;  %p1028_p7 = scmp.lt.s32.totalorder %s620_s23, %s1026_s16 }
  0x77   : > { %818 = vmatpush3.bf16.msra.mxu0 %v913_v12  ;;  %p1024_p3 = pneg %p1023_p5  ;;  %p1029_p9 = scmp.lt.s32.totalorder %s1027_s15, %s1021_s0 }
  0x78   : > { %819 = vmatprep.subr.bf16.mxu0 %v1135_v0 }
  0x79   : > { %p1030_p13 = por %p1029_p9, %p1028_p7 }
  0x7b   : > { %820 = vmatpush3.bf16.msra.mxu0 %v914_v13  ;;  %p1031_p2 = pnand %p1030_p13, %p1024_p3 }
 0x135   : > { %v456_v8 = vpop.f32.mrf.mxu0 }
 0x136   : > { %v460_v9 = vsub.f32 %v456_v8, %v780_v1 }
 0x137   : > { %v808_v10 = vpop.f32.mrf.mxu0 }
 0x138   : > { %v461_v11 = vpack.c.bf16 %v460_v9, %v460_v9 }
 0x13a   : > { %814 = vmatmul.mubr.msk.bf16.vlgmr.msra.gmra.mxu1 %vm487_vm2, %v461_v11  ;;  %463 = vst.msk [vmem:[%s366_s19] sm:$0xf] %vm462_vm3, %v461_v11 }
 0x1fa   : > { %v525_v15 = vpop.f32.mrf.mxu1 }
 0x1fb   : > { %v526_v16 = vadd.f32 %v782_v14, %v525_v15 }
 0x1fc   : > { %v815_v17 = vpop.f32.mrf.mxu1 }
 0x1fd   : > { %v531_v18 = vmax.f32 %v526_v16, 0.0 }
 0x1fe   : > { %v528_v19 = vpop.f32.mrf.mxu1 }
 0x1ff   : > { %v536_v20 = vpack.c.bf16 %v531_v18, %v531_v18 }
 0x200   : > { %v816_v21 = vpop.f32.mrf.mxu1 }
 0x201   : > { %822 = vmatmul.mubr.msk.bf16.vlgmr.msra.gmra.mxu0 %vm487_vm2, %v536_v20 }
 0x202   : > { %1034 = shalt.err (!%p1031_p2)
}
 0x203   : > { %s1035_s11 = scalar_lea.hbm %s617_s17, 64  ;;  %s1039_s21 = scalar_lea.hbm %s1422_s7, 128 }
 0x204   : > { %p1036_p1 = scmp.ne.s32.totalorder %s617_s17, %s1035_s11  ;;  %p1040_p11 = scmp.lt.s32.totalorder %s617_s17, %s1422_s7 }
 0x205   : > { %p1041_p4 = scmp.lt.s32.totalorder %s1039_s21, %s1035_s11 }
 0x206   : > { %p1037_p8 = pnand %p1036_p1, %p1449_p0 }
 0x207   : > { %p1042_p6 = por %p1041_p4, %p1040_p11 }
 0x208   : > { %p1038_p10 = pneg %p1037_p8 }
 0x20a   : > { %p1043_p12 = pnand %p1042_p6, %p1038_p10 }
 0x20c   : > { %1046 = shalt.err (!%p1043_p12)
}
 0x20d   : > { %839 = dma.vmem_to_hbm [thread:$0]  (%p1449_p0), %s620_s23, 64, %s617_s17, %s601_s26   ;;  %v786_v22 = vld [vmem:[%s1421_s6] ss:$0 sm:$0xff] }
 0x20e   : > { %s779_s14 = sshll.u32 %s1316_s3, 3  ;;  %s793_s5 = sshll.u32 %s1205_s9, 7 }
 0x20f   : > { %s373_s16 = scalar_lea.vmem [#allocation11], %s779_s14  ;;  %s1371_s19 = scalar_lea.hbm %s1423_s8, %s793_s5 }
 0x210   : > { %s632_s15 = sshll.u32 %s373_s16, 4  ;;  %s606_s23 = scalar_lea.sflag [#allocation12], %s1316_s3  ;;  %s1373_s15 = int_to_ptr.vmem [resolvable:$true] %s632_s15 }
 0x211   : > { %s1047_s9 = scalar_lea.vmem %s1373_s15, 128  ;;  %s1138_s17 = smov [#allocation11]  }
 0x212   : > { %p1048_p5 = scmp.ne.s32.totalorder %s1373_s15, %s1047_s9  ;;  %s1051_s26 = sshll.u32 %s1138_s17, 4  ;;  %s1052_s26 = int_to_ptr.vmem [resolvable:$false] %s1051_s26 }
 0x213   : > { %s1053_s21 = scalar_lea.vmem %s1052_s26, 256  ;;  %p1054_p9 = scmp.lt.s32.totalorder %s1373_s15, %s1052_s26 }
 0x214   : > { %p1049_p3 = pnand %p1048_p5, %p1449_p0  ;;  %p1055_p13 = scmp.lt.s32.totalorder %s1053_s21, %s1047_s9 }
 0x216   : > { %p1050_p7 = pneg %p1049_p3  ;;  %p1056_p2 = por %p1055_p13, %p1054_p9 }
 0x218   : > { %p1057_p1 = pnand %p1056_p2, %p1050_p7 }
 0x2c1   : > { %v593_v23 = vpop.f32.mrf.mxu0 }
 0x2c2   : > { %v594_v24 = vadd.f32 %v786_v22, %v593_v23 }
 0x2c3   : > { %v823_v25 = vpop.f32.mrf.mxu0 }
 0x2c4   : > { %599 = vst.msk [vmem:[%s373_s16] sm:$0xff] %vm487_vm2, %v594_v24 }
 0x2c5   : > { %v596_v26 = vpop.f32.mrf.mxu0 }
 0x2c6   : > { %1060 = shalt.err (!%p1057_p1)
}
 0x2c7   : > { %s1061_s10 = scalar_lea.hbm %s1371_s19, 128  ;;  %s1065_s14 = scalar_lea.hbm %s1423_s8, 256 }
 0x2c8   : > { %p1062_p8 = scmp.ne.s32.totalorder %s1371_s19, %s1061_s10  ;;  %p1066_p4 = scmp.lt.s32.totalorder %s1371_s19, %s1423_s8 }
 0x2c9   : > { %p1067_p6 = scmp.lt.s32.totalorder %s1065_s14, %s1061_s10 }
 0x2ca   : > { %p1063_p10 = pnand %p1062_p8, %p1449_p0 }
 0x2cb   : > { %p1068_p12 = por %p1067_p6, %p1066_p4 }
 0x2cc   : > { %p1064_p11 = pneg %p1063_p10 }
 0x2ce   : > { %p1069_p5 = pnand %p1068_p12, %p1064_p11 }
 0x2d0   : > { %1072 = shalt.err (!%p1069_p5)
}
 0x2d1   : > { %840 = dma.vmem_to_hbm [thread:$0]  (%p1449_p0), %s1373_s15, 128, %s1371_s19, %s606_s23   ;;  %v824_v27 = vpop.f32.mrf.mxu0 }
 0x2d2 PF: > { %s644_s5 = sand.u32 1, %s1115_s27   ;;  %p1450_p3 = scmp.ne.s32.totalorder %s1432_s12, 0 }
 0x2d3   : > { %p1451_p7 = scmp.ge.s32.totalorder %s1127_s30, 2  ;;  %s645_s16 = scalar_lea.sflag [#allocation4], %s644_s5 }
 0x2d5   : > { %p858_p9 = pnand %p1451_p7, %p1450_p3 }
 0x2d7   : > { %p859_p13 = pneg %p858_p9 }
 0x2d9   : > { %1106 = dma.done.wait (%p859_p13), %s645_s16, 64  }
 0x2da   : > { %1108 = vsyncadd (%p859_p13), %s645_s16, 4294967232  ;;  %s654_s11 = scalar_lea.sflag [#allocation12], %s644_s5 }
 0x2db   : > { %1110 = dma.done.wait (%p859_p13), %s654_s11, 128  }
 0x2dc   : > { %1112 = vsyncadd (%p859_p13), %s654_s11, 4294967168  ;;  %p27_p0 = scmp.ge.s32.totalorder %s1264_s18, 4   ;;  %s1452_s27 = smov %s1119_s28 }
 0x2dd   : > { %s1453_s28 = smov %s1123_s29  ;;  %s1454_s29 = smov %s1274_s24 }
 0x2de   : > { %s1455_s30 = smov %s1264_s18  ;;  %29 = sbr.rel (!%p27_p0) target bundleno = 13 (0xd), region = 123 }
 0x2e3   :  { %659 = vsyncpa [#allocation3], 1 }
 0x2e4   :  { %661 = vsyncpa [#allocation3 + $0x1], 1 }
 0x2e5   :  { %662 = vsyncpa [#allocation6], 1 }
 0x2e6   :  { %664 = vsyncpa [#allocation6 + $0x1], 1 }
 0x2e7   :  { %665 = vsyncpa [#allocation9], 1 }
 0x2e8   :  { %666 = vsyncpa [#allocation4], 1 }
 0x2e9   :  { %668 = vsyncpa [#allocation4 + $0x1], 1 }
 0x2ea   :  { %669 = vsyncpa [#allocation12], 1 }
 0x2eb   :  { %671 = vsyncpa [#allocation12 + $0x1], 1 }

</bundles_post_ra>
